<compile_context>
chip_gen: v6e
topology: v6e:2x2x1
jax: 0.10.0
libtpu: 0.0.40
codegen_flags: <defaults>
</compile_context>

<pallas_src>
import functools

import jax
import jax.numpy as jnp
from jax.experimental import pallas as pl
from jax.experimental.pallas import tpu as pltpu


# --------------------------------------------------------------------------- kernels


def _attn_pool_single_kernel(x_ref, w_ref, out_ref):
    """Whole-image path: one grid step per batch block, no online-softmax state."""
    x = x_ref[...]                                     # (Bt, C, HW)  native dtype
    w = w_ref[...][None]                               # (1, C, 1)    f32
    # 1x1-conv logits on the VPU: f32 multiply + sublane (C) reduction.
    logits = jnp.sum(w * x, axis=1, keepdims=True)     # (Bt, 1, HW)  f32
    m = jnp.max(logits, axis=-1, keepdims=True)        # (Bt, 1, 1)
    e = jnp.exp(logits - m)                            # (Bt, 1, HW)  f32
    l = jnp.sum(e, axis=-1, keepdims=True)             # (Bt, 1, 1)
    # Weighted pool on the MXU: x stays LHS with HW on lanes (no x-tile transpose).
    pooled = jnp.einsum("bck,bok->bco", x, e.astype(x.dtype),
                        preferred_element_type=jnp.float32)        # (Bt, C, 1)
    inv = pl.reciprocal(l, approx=True)                # EUP slot, once per batch block
    out_ref[...] = (pooled * inv).astype(out_ref.dtype)


def _attn_pool_online_kernel(x_ref, w_ref, out_ref, m_sc, l_sc, acc_sc, *,
                             hw_valid, tk):
    """HW-tiled path: online softmax over the spatial axis (last grid axis)."""
    k = pl.program_id(1)

    @pl.when(k == 0)
    def _init():
        m_sc[...] = jnp.full(m_sc.shape, -jnp.inf, dtype=m_sc.dtype)
        l_sc[...] = jnp.zeros(l_sc.shape, dtype=l_sc.dtype)
        acc_sc[...] = jnp.zeros(acc_sc.shape, dtype=acc_sc.dtype)

    x = x_ref[...]                                     # (Bt, C, Tk)  native dtype
    w = w_ref[...][None]                               # (1, C, 1)    f32

    # Python-level flag: masking code is only traced when HW % Tk != 0 (ragged tail).
    needs_mask = (hw_valid % tk) != 0
    if needs_mask:
        pos = k * tk + jax.lax.broadcasted_iota(jnp.int32, (1, 1, tk), 2)
        valid = pos < hw_valid                         # (1, 1, Tk)
        # Zero out-of-range (garbage-padded) columns so they cannot poison the pool.
        x = jnp.where(valid, x, jnp.zeros_like(x))

    # 1x1-conv logits on the VPU: f32 multiply + sublane (C) reduction.
    logits = jnp.sum(w * x, axis=1, keepdims=True)     # (Bt, 1, Tk)  f32
    if needs_mask:
        logits = jnp.where(valid, logits, -jnp.inf)    # padded columns -> zero weight

    m_prev = m_sc[...]                                                   # (Bt,1,1)
    m_new = jnp.maximum(m_prev, jnp.max(logits, axis=-1, keepdims=True))
    alpha = jnp.exp(m_prev - m_new)
    e = jnp.exp(logits - m_new)                                          # (Bt,1,Tk)
    l_sc[...] = alpha * l_sc[...] + jnp.sum(e, axis=-1, keepdims=True)
    # Unnormalized pooled contribution on the MXU (x natural LHS, Tk contracted).
    acc_sc[...] = alpha * acc_sc[...] + jnp.einsum(
        "bck,bok->bco", x, e.astype(x.dtype),
        preferred_element_type=jnp.float32)                              # (Bt,C,1)
    m_sc[...] = m_new

    @pl.when(k == pl.num_programs(1) - 1)
    def _finalize():
        inv = pl.reciprocal(l_sc[...], approx=True)                      # (Bt,1,1)
        out_ref[...] = (acc_sc[...] * inv).astype(out_ref.dtype)         # (Bt,C,1)


# ------------------------------------------------------------------- tiling heuristics


def _vmem_budget():
    """(input block budget, vmem_limit_bytes) chosen per TPU generation."""
    try:
        cap = int(getattr(pltpu.get_tpu_info(), "vmem_capacity_bytes", 0))
    except Exception:
        cap = 0
    if cap <= 0:
        cap = 64 * 1024 * 1024                    # conservative: assume v7x-sized VMEM
    if cap <= 64 * 1024 * 1024:
        # v7x-class: 64 MiB per TensorCore -> 2x double-buffered input + scratch < 48 MiB
        return 12 * 1024 * 1024, 48 * 1024 * 1024
    # v5e / v6e: 128 MiB physical VMEM
    return 24 * 1024 * 1024, 96 * 1024 * 1024


def _choose_tiles(B, C, HW, itemsize, block_budget_bytes):
    """Pick (Bt, Tk).  Tk == HW -> single-step kernel; Tk < HW -> online-softmax kernel."""
    per_batch = C * HW * itemsize
    if per_batch <= block_budget_bytes:
        # Whole image fits one block: pack as many batches as the budget allows,
        # but keep the parallel (batch) grid axis at >= 2 steps when B > 1 so both
        # v7x TensorCores get work.
        max_bt = max(1, block_budget_bytes // per_batch)
        if B > 1:
            max_bt = max(1, min(max_bt, B // 2))
        bt = 1
        for cand in range(min(B, max_bt), 0, -1):
            if B % cand == 0:
                bt = cand
                break
        return bt, HW

    # Large image: tile HW (online softmax).  Tk multiple of 128, each strided DMA
    # row chunk >= 512 B, within the block budget.  Prefer an exact divisor of HW;
    # otherwise fall back to the largest fitting Tk and mask the ragged tail.
    min_tk = ((max(512 // itemsize, 128) + 127) // 128) * 128
    max_tk = max(min_tk, (block_budget_bytes // (C * itemsize)) // 128 * 128)
    cand = min(max_tk, (HW // 128) * 128)
    while cand >= min_tk:
        if HW % cand == 0:
            return 1, cand
        cand -= 128
    return 1, min(max_tk, ((HW + 127) // 128) * 128)


# ---------------------------------------------------------------------------- wrapper


def attention_pooling_2d(x_nchw, weight, bias=None, *,
                         block_budget_bytes=None, vmem_limit_bytes=None):
    """x_nchw: (B, C, H, W); weight: (1, C, 1, 1); bias: (1,).  Returns (B, C).

    `bias` is accepted for API compatibility with nn.Conv2d(channels, 1, 1) but is
    not used: softmax(logits + b) == softmax(logits) for a scalar bias, so the
    1x1-conv bias can never affect the pooled output.
    """
    del bias
    B, C, H, W = x_nchw.shape
    HW = H * W
    dtype = x_nchw.dtype
    x = x_nchw.reshape(B, C, HW)                    # native dtype, no up-cast in wrapper
    w = weight.reshape(C, 1).astype(jnp.float32)    # C on sublanes (matches x layout)

    itemsize = jnp.dtype(dtype).itemsize
    default_budget, default_limit = _vmem_budget()
    budget = block_budget_bytes or default_budget
    limit = vmem_limit_bytes or default_limit

    Bt, Tk = _choose_tiles(B, C, HW, itemsize, budget)
    cost = pl.CostEstimate(
        flops=int(4 * B * C * HW),                  # two C*HW contractions per batch
        transcendentals=int(B * HW),                # exp over the spatial axis
        bytes_accessed=int(B * C * HW * itemsize + C * 4 + B * C * itemsize),
    )

    if Tk == HW:
        # ------------------------------------------------ whole-image, single-step path
        grid = (B // Bt,)
        out = pl.pallas_call(
            _attn_pool_single_kernel,
            out_shape=jax.ShapeDtypeStruct((B, C, 1), dtype),
            grid=grid,
            in_specs=[
                pl.BlockSpec((Bt, C, HW), lambda i: (i, 0, 0)),
                pl.BlockSpec((C, 1), lambda i: (0, 0)),
            ],
            out_specs=pl.BlockSpec((Bt, C, 1), lambda i: (i, 0, 0)),
            compiler_params=pltpu.CompilerParams(
                dimension_semantics=("parallel",),
                vmem_limit_bytes=limit,
            ),
            cost_estimate=cost,
        )(x, w)
    else:
        # ------------------------------------------------ HW-tiled online-softmax path
        num_k = pl.cdiv(HW, Tk)
        grid = (B // Bt, num_k)
        kernel = functools.partial(_attn_pool_online_kernel, hw_valid=HW, tk=Tk)
        out = pl.pallas_call(
            kernel,
            out_shape=jax.ShapeDtypeStruct((B, C, 1), dtype),
            grid=grid,
            in_specs=[
                pl.BlockSpec((Bt, C, Tk), lambda i, k: (i, 0, k)),
                pl.BlockSpec((C, 1), lambda i, k: (0, 0)),
            ],
            # Output block constant across the HW ("arbitrary") axis -> resident
            # accumulator target, written once on the last HW step.
            out_specs=pl.BlockSpec((Bt, C, 1), lambda i, k: (i, 0, 0)),
            scratch_shapes=[
                pltpu.VMEM((Bt, 1, 1), jnp.float32),    # running max
                pltpu.VMEM((Bt, 1, 1), jnp.float32),    # running sum
                pltpu.VMEM((Bt, C, 1), jnp.float32),    # running unnormalized pool
            ],
            compiler_params=pltpu.CompilerParams(
                dimension_semantics=("parallel", "arbitrary"),
                vmem_limit_bytes=limit,
            ),
            cost_estimate=cost,
        )(x, w)
    return out.reshape(B, C)


def attention_pooling_2d_ref(x_nchw, weight, bias):
    """Pure-JAX reference (keeps the bias to empirically confirm shift-invariance)."""
    B, C, H, W = x_nchw.shape
    x = x_nchw.reshape(B, C, H * W).astype(jnp.float32)
    w = weight.reshape(1, C).astype(jnp.float32)
    logits = jnp.einsum("oc,bcs->bos", w, x) + bias.reshape(1, 1, 1)   # (B,1,HW)
    attn = jax.nn.softmax(logits, axis=-1)                             # (B,1,HW)
    pooled = jnp.einsum("bcs,bos->bc", x, attn)                        # (B,C)
    return pooled


if __name__ == "__main__":
    key = jax.random.PRNGKey(0)
    kx, kw, kb = jax.random.split(key, 3)

    # --- Path 1: whole-image (single-step) kernel, shapes implied by the module.
    B, C, H, W = 2, 4, 16, 16
    x = jax.random.normal(kx, (B, C, H, W), dtype=jnp.float32)
    weight = jax.random.normal(kw, (1, C, 1, 1), dtype=jnp.float32) * 0.1
    bias = jax.random.normal(kb, (1,), dtype=jnp.float32) * 0.1

    out = jax.block_until_ready(attention_pooling_2d(x, weight, bias))
    ref = attention_pooling_2d_ref(x, weight, bias)
    assert out.shape == (B, C)
    err = float(jnp.max(jnp.abs(out - ref)))
    assert jnp.allclose(out, ref, atol=1e-2, rtol=1e-2), f"single path max err {err}"

    # --- Path 2: HW-tiled online-softmax kernel (forced via a tiny block budget).
    B2, C2, H2, W2 = 2, 8, 32, 32          # HW = 1024 -> Tk = 256, 4 k-steps
    x2 = jax.random.normal(kx, (B2, C2, H2, W2), dtype=jnp.float32)
    w2 = jax.random.normal(kw, (1, C2, 1, 1), dtype=jnp.float32) * 0.1
    out2 = jax.block_until_ready(
        attention_pooling_2d(x2, w2, bias, block_budget_bytes=C2 * 256 * 4))
    ref2 = attention_pooling_2d_ref(x2, w2, bias)
    err2 = float(jnp.max(jnp.abs(out2 - ref2)))
    assert jnp.allclose(out2, ref2, atol=1e-2, rtol=1e-2), f"tiled path max err {err2}"

    # --- Path 3: ragged HW (HW = 400, Tk = 256 -> masked tail block).
    B3, C3, H3, W3 = 2, 8, 20, 20
    x3 = jax.random.normal(kx, (B3, C3, H3, W3), dtype=jnp.float32)
    w3 = jax.random.normal(kw, (1, C3, 1, 1), dtype=jnp.float32) * 0.1
    out3 = jax.block_until_ready(
        attention_pooling_2d(x3, w3, bias, block_budget_bytes=C3 * 256 * 4))
    ref3 = attention_pooling_2d_ref(x3, w3, bias)
    err3 = float(jnp.max(jnp.abs(out3 - ref3)))
    assert jnp.allclose(out3, ref3, atol=1e-2, rtol=1e-2), f"ragged path max err {err3}"

    print("KERNEL_OK")
</pallas_src>

<mosaic_0001>
module attributes {stable_mosaic.version = 11 : i64} {
  func.func @_attn_pool_single_kernel(%arg0: i32, %arg1: memref<1x4x256xf32, #tpu.memory_space<vmem>>, %arg2: memref<4x1xf32, #tpu.memory_space<vmem>>, %arg3: memref<1x4x1xf32, #tpu.memory_space<vmem>>) attributes {dimension_semantics = [#tpu.dimension_semantics<parallel>], iteration_bounds = array<i64: 2>, scalar_prefetch = 0 : i64, scratch_operands = 0 : i64, tpu.core_type = #tpu.core_type<tc>, window_params = [{transform_indices = @transform_0, window_bounds = array<i64: 1, 4, 256>}, {pipeline_mode = #tpu.pipeline_mode<synchronous>, transform_indices = @transform_1, window_bounds = array<i64: 4, 1>}, {transform_indices = @transform_2, window_bounds = array<i64: 1, 4, 1>}]} {
    %c0 = arith.constant 0 : index
    %c0_0 = arith.constant 0 : index
    %c0_1 = arith.constant 0 : index
    %0 = vector.load %arg1[%c0, %c0_0, %c0_1] : memref<1x4x256xf32, #tpu.memory_space<vmem>>, vector<1x4x256xf32>
    %c0_2 = arith.constant 0 : index
    %c0_3 = arith.constant 0 : index
    %1 = vector.load %arg2[%c0_2, %c0_3] : memref<4x1xf32, #tpu.memory_space<vmem>>, vector<4x1xf32>
    %2 = vector.shape_cast %1 : vector<4x1xf32> to vector<1x4x1xf32>
    %3 = vector.broadcast %2 : vector<1x4x1xf32> to vector<1x4x256xf32>
    %4 = arith.mulf %3, %0 : vector<1x4x256xf32>
    %cst = arith.constant dense<0.000000e+00> : vector<1x256xf32>
    %5 = vector.multi_reduction <add>, %4, %cst [1] : vector<1x4x256xf32> to vector<1x256xf32>
    %6 = vector.shape_cast %5 : vector<1x256xf32> to vector<1x1x256xf32>
    %cst_4 = arith.constant dense<0xFF800000> : vector<1x1xf32>
    %7 = vector.multi_reduction <maximumf>, %6, %cst_4 [2] : vector<1x1x256xf32> to vector<1x1xf32>
    %8 = vector.shape_cast %7 : vector<1x1xf32> to vector<1x1x1xf32>
    %9 = vector.broadcast %8 : vector<1x1x1xf32> to vector<1x1x256xf32>
    %10 = arith.subf %6, %9 : vector<1x1x256xf32>
    %11 = math.exp %10 : vector<1x1x256xf32>
    %cst_5 = arith.constant dense<0.000000e+00> : vector<1x1xf32>
    %12 = vector.multi_reduction <add>, %11, %cst_5 [2] : vector<1x1x256xf32> to vector<1x1xf32>
    %13 = vector.shape_cast %12 : vector<1x1xf32> to vector<1x1x1xf32>
    "tpu.trace_start"() <{level = 10 : i32, message = "bck,bok->bco"}> : () -> ()
    %cst_6 = arith.constant dense<0.000000e+00> : vector<1x4x1xf32>
    %14 = tpu.matmul %0, %11, %cst_6 {dimension_numbers = #tpu.dot_dimension_numbers<[2], [2], [1], [1], [0, 0, 0, 1, 1, 1], [0], [0]>} : vector<1x4x256xf32>, vector<1x1x256xf32>, vector<1x4x1xf32> -> vector<1x4x1xf32>
    "tpu.trace_stop"() : () -> ()
    %15 = tpu.reciprocal %13 {approx = true} : vector<1x1x1xf32> -> vector<1x1x1xf32>
    %16 = vector.broadcast %15 : vector<1x1x1xf32> to vector<1x4x1xf32>
    %17 = arith.mulf %14, %16 : vector<1x4x1xf32>
    %c0_7 = arith.constant 0 : index
    %c0_8 = arith.constant 0 : index
    %c0_9 = arith.constant 0 : index
    %18 = vector.load %arg3[%c0_7, %c0_8, %c0_9] : memref<1x4x1xf32, #tpu.memory_space<vmem>>, vector<1x4x1xf32>
    tpu.vector_store %arg3[%c0_7, %c0_8, %c0_9], %17 {strides = array<i32>} : memref<1x4x1xf32, #tpu.memory_space<vmem>>, vector<1x4x1xf32>,
    return
  }
  func.func @transform_0(%arg0: i32) -> (i32, i32, i32) {
    %c0_i32 = arith.constant 0 : i32
    %c0_i32_0 = arith.constant 0 : i32
    %c0_i32_1 = arith.constant 0 : i32
    return %arg0, %c0_i32, %c0_i32_0 : i32, i32, i32
  }
  func.func @transform_1(%arg0: i32) -> (i32, i32) {
    %c0_i32 = arith.constant 0 : i32
    %c0_i32_0 = arith.constant 0 : i32
    %c0_i32_1 = arith.constant 0 : i32
    return %c0_i32, %c0_i32_0 : i32, i32
  }
  func.func @transform_2(%arg0: i32) -> (i32, i32, i32) {
    %c0_i32 = arith.constant 0 : i32
    %c0_i32_0 = arith.constant 0 : i32
    %c0_i32_1 = arith.constant 0 : i32
    return %arg0, %c0_i32, %c0_i32_0 : i32, i32, i32
  }
}

</mosaic_0001>

<bundles_post_ra>
// kernel: tpu_custom_call.1
= control target key start
LH: loop header
LB: loop body
LE: loop exit
PB: predicated region body
PF: predicated region fallthrough
CT: control target
= control target key end

     0   :  { %7 = vsyncpa [#allocation3], 0  ;;  %s529_s0 = inlined_call_operand.hbm [shape: f32[2,4,256], index: 0, kind: input, shape index: {}]   ;;  %s530_s1 = inlined_call_operand.vmem [shape: f32[4,1], index: 1, kind: input, shape index: {}]   ;;  %s531_s2 = inlined_call_operand.vmem [shape: f32[2,4,1], index: 2, kind: output, shape index: {}]  }
   0x1   :  { %9 = vsyncpa [#allocation3 + $0x1], 0  ;;  %s422_s9 = smov 0   ;;  %s424_s10 = smov 0  }
   0x2   :  { %s426_s11 = smov 0   ;;  %s428_s12 = smov 0  }
   0x3 LB: > { %s441_s13 = sadd.s32 4294967295, %s403_s12   ;;  %s444_s14 = sadd.s32 1, %s403_s12   ;;  %s403_s12 = sphi %s428_s12, %s541_s12   ;;  %s399_s11 = sphi %s426_s11, %s540_s11   ;;  %s395_s10 = sphi %s424_s10, %s539_s10   ;;  %s391_s9 = sphi %s422_s9, %s538_s9  }
   0x4   : > { %s19_s15 = ssub.s32 %s403_s12, %s444_s14  ;;  %s22_s16 = sadd.s32 1, %s399_s11 }
   0x5   : > { %p20_p0 = scmp.eq.s32.totalorder %s19_s15, 0  ;;  %p29_p1 = scmp.ne.s32.totalorder %s399_s11, %s395_s10 }
   0x6   : > { %p30_p2 = scmp.eq.s32.totalorder %s403_s12, 0  ;;  %p35_p3 = scmp.ne.s32.totalorder %s395_s10, %s391_s9 }
   0x7   : > { %s454_s17 = scalar_select %p20_p0, %s399_s11, %s22_s16  }
   0x8   : > { %p31_p4 = por %p30_p2, %p29_p1  ;;  %p36_p5 = scmp.eq.s32.totalorder %s441_s13, 0 }
   0x9   : > { %p299_p6 = scmp.lt.s32.totalorder %s403_s12, 2  ;;  %s109_s19 = sand.u32 1, %s399_s11  }
   0xa   : > { %p458_p7 = por %p36_p5, %p35_p3  ;;  %s284_s20 = sshll.u32 %s109_s19, 3 }
   0xb   : > { %s292_s21 = sshll.u32 %s403_s12, 7  ;;  %s113_s25 = scalar_lea.vmem [#allocation2], %s284_s20 }
   0xc   : > { %s533_s18 = scalar_select %p458_p7, 1, 0 }
   0xd   : > { %s467_s24 = scalar_lea.hbm %s529_s0, %s292_s21  ;;  %s121_s26 = sshll.u32 %s113_s25, 4  ;;  %s469_s26 = int_to_ptr.vmem [resolvable:$true] %s121_s26 }
   0xe   : > { %p471_p8 = pnand %p299_p6, %p31_p4  ;;  %s110_s28 = scalar_lea.sflag [#allocation3], %s109_s19 }
   0xf   : > { %s341_s29 = scalar_lea.hbm %s467_s24, 128  ;;  %s346_s4 = scalar_lea.hbm %s529_s0, 256 }
  0x10   : > { %p342_p11 = scmp.ne.s32.totalorder %s467_s24, %s341_s29  ;;  %p343_p12 = pneg %p471_p8 }
  0x11   : > { %p347_p1 = scmp.lt.s32.totalorder %s467_s24, %s529_s0  ;;  %p348_p2 = scmp.lt.s32.totalorder %s346_s4, %s341_s29 }
  0x12   : > { %p344_p13 = pnand %p343_p12, %p342_p11 }
  0x13   : > { %p349_p3 = por %p348_p2, %p347_p1 }
  0x14   : > { %p345_p0 = pneg %p344_p13 }
  0x16   : > { %p350_p4 = pnand %p349_p3, %p345_p0 }
  0x18   : > { %353 = shalt.err (!%p350_p4)
}
  0x19   : > { %s354_s7 = scalar_lea.vmem %s469_s26, 128  ;;  %s405_s8 = smov [#allocation2]  }
  0x1a   : > { %p355_p5 = scmp.ne.s32.totalorder %s469_s26, %s354_s7  ;;  %s359_s9 = sshll.u32 %s405_s8, 4  ;;  %s360_s9 = int_to_ptr.vmem [resolvable:$false] %s359_s9 }
  0x1b   : > { %s361_s15 = scalar_lea.vmem %s360_s9, 256  ;;  %p362_p13 = scmp.lt.s32.totalorder %s469_s26, %s360_s9 }
  0x1c   : > { %p357_p6 = pnand %p355_p5, %p343_p12  ;;  %p363_p9 = scmp.lt.s32.totalorder %s361_s15, %s354_s7 }
  0x1e   : > { %p358_p11 = pneg %p357_p6  ;;  %p364_p10 = por %p363_p9, %p362_p13 }
  0x20   : > { %p365_p7 = pnand %p364_p10, %p358_p11 }
  0x22   : > { %368 = shalt.err (!%p365_p7)
}
  0x23   : > { %298 = dma.hbm_to_vmem [thread:$0]  (!%p471_p8), %s467_s24, 128, %s469_s26, %s110_s28  }
  0x24   : > { %p535_p0 = scmp.lt.s32.totalorder %s403_s12, 3  ;;  %p536_p1 = scmp.ge.s32.totalorder %s403_s12, 1 }
  0x26   : > { %p127_p12 = pnand %p536_p1, %p535_p0 }
  0x27   : > { %s132_s16 = sand.u32 (!%p127_p12), 1, %s395_s10   ;;  %p537_p9 = scmp.ne.s32.totalorder (!%p127_p12), %s533_s18, 0 }
  0x28   : > { %130 = sbr.rel (%p127_p12) target bundleno = 503 (0x1f7), region = 28  ;;  %s288_s19 = sshll.u32 (!%p127_p12), %s132_s16, 3 }
  0x29   : > { %s133_s20 = scalar_lea.sflag (!%p127_p12), [#allocation3], %s132_s16  ;;  %s136_s21 = scalar_lea.vmem (!%p127_p12), [#allocation2], %s288_s19 }
  0x2d   : > { %386 = dma.done.wait (%p537_p9), %s133_s20, 128  }
  0x2e   : > { %388 = vsyncadd (%p537_p9), %s133_s20, 4294967168  ;;  %v406_v0 = vmov 0   ;;  %v161_v1 = vld [vmem:[%s530_s1] sm:$0xf]  ;;  %vm172_vm0 = vcmask 1043456   ;;  %p156_p7 = scmp.lt.s32.totalorder %s441_s13, 1 }
  0x2f   : > { %333 = vset.pattern.permute.xlu0 %v406_v0  ;;  %v160_v2 = vld [vmem:[%s136_s21] sm:$0xff]  ;;  %vm214_vm1 = vcmask 3072  }
  0x30   : > { %164 = vperm.xlu0 %333, %v161_v1   ;;  %v168_v3 = vcombine.high %v160_v2, %v160_v2  ;;  %s543_s13 = smov (!%p156_p7, %s441_s13), 1 }
  0x31   : > { %s289_s12 = sshll.u32 %s543_s13, 2 }
  0x32   : > { %s159_s25 = scalar_lea.vmem %s531_s2, %s289_s12 }
  0xab   : > { %v165_v4 = vpop.permute.xlu0 %164 }
  0xac   : > { %v170_v5 = vmul.f32 %v165_v4, %v160_v2  ;;  %v171_v6 = vmul.f32 %v168_v3, %v165_v4 }
  0xae   : > { %v173_v7 = vsel %vm172_vm0, %v170_v5, 0.0  ;;  %v180_v8 = vsel %vm172_vm0, %v171_v6, 0.0 }
  0xaf   : > { %v174_v9 = vrot.slane %v173_v7, 4  ;;  %v181_v10 = vrot.slane %v180_v8, 4 }
  0xb1   : > { %v175_v11 = vadd.f32 %v174_v9, %v173_v7  ;;  %v182_v12 = vadd.f32 %v181_v10, %v180_v8 }
  0xb3   : > { %v176_v13 = vrot.slane %v175_v11, 2  ;;  %v183_v14 = vrot.slane %v182_v12, 2 }
  0xb5   : > { %v177_v15 = vadd.f32 %v176_v13, %v175_v11  ;;  %v184_v16 = vadd.f32 %v183_v14, %v182_v12 }
  0xb7   : > { %v178_v17 = vrot.slane %v177_v15, 1  ;;  %v185_v18 = vrot.slane %v184_v16, 1 }
  0xb9   : > { %v179_v19 = vadd.f32 %v178_v17, %v177_v15  ;;  %v186_v20 = vadd.f32 %v185_v18, %v184_v16 }
  0xbb   : > { %v187_v21 = vmax.f32 %v179_v19, %v186_v20 }
  0xbd   : > { %188 = vmax.xlane.f32.xlu0 %v187_v21 }
 0x146   : > { %v189_v22 = vpop.xlane.xlu0 %188 }
 0x147   : > { %v190_v23 = vsub.f32 %v179_v19, %v189_v22  ;;  %v191_v24 = vsub.f32 %v186_v20, %v189_v22 }
 0x149   : > { %v192_v25 = vmul.f32 1.442695, %v190_v23  ;;  %v194_v26 = vmul.f32 1.442695, %v191_v24 }
 0x14b   : > { %335 = vpow2.f32 %v192_v25 }
 0x14c   : > { %337 = vpow2.f32 %v194_v26 }
 0x158   : > { %v336_v27 = vpop.eup %335 }
 0x159   : > { %v338_v28 = vpop.eup %337 }
 0x15a   : > { %v196_v29 = vadd.f32 %v338_v28, %v336_v27  ;;  %v201_v30 = vcombine.low %v336_v27, %v338_v28 }
 0x15c   : > { %197 = vadd.xlane.f32.xlu1 %v196_v29  ;;  %v203_v31 = vmul.f32 %v201_v30, %v160_v2 }
 0x15e   : > { %v205_v32 = vcombine.high %v203_v31, %v203_v31  ;;  %v207_v33 = vsel %vm172_vm0, %v203_v31, 0.0 }
 0x160   : > { %v208_v34 = vsel %vm172_vm0, %v205_v32, 0.0 }
 0x161   : > { %v209_v35 = vadd.f32 %v208_v34, %v207_v33 }
 0x163   : > { %210 = vadd.xlane.f32.xlu1 %v209_v35 }
 0x1e5   : > { %v198_v36 = vpop.xlane.xlu1 %197 }
 0x1e6   : > { %339 = vrcp.f32 %v198_v36 }
 0x1ec   : > { %v211_v38 = vpop.xlane.xlu1 %210 }
 0x1f3   : > { %v340_v37 = vpop.eup %339 }
 0x1f4   : > { %v213_v39 = vmul.f32 %v340_v37, %v211_v38 }
 0x1f6   : > { %215 = vst.msk [vmem:[%s159_s25] sm:$0xf] %vm214_vm1, %v213_v39 }
 0x1f7 PF: > { %p12_p8 = scmp.ge.s32.totalorder %s444_s14, 4   ;;  %s538_s9 = smov %s395_s10 }
 0x1f8   : > { %s539_s10 = smov %s399_s11  ;;  %s540_s11 = smov %s454_s17 }
 0x1f9   : > { %s541_s12 = smov %s444_s14  ;;  %14 = sbr.rel (!%p12_p8) target bundleno = 3 (0x3), region = 68 }
 0x1fe   :  { %235 = vsyncpa [#allocation3], 1 }
 0x1ff   :  { %237 = vsyncpa [#allocation3 + $0x1], 1 }

</bundles_post_ra>
